<compile_context>
chip_gen: v7x
topology: tpu7x:2x2x1
jax: 0.10.0
libtpu: 0.0.40
codegen_flags: <defaults>
</compile_context>

<pallas_src>
import jax
import jax.numpy as jnp
from jax import lax
from jax.experimental import pallas as pl
from jax.experimental.pallas import tpu as pltpu


def _gemm_bias_kernel(x_ref, w_ref, b_ref, o_ref):
    # x_ref: (TM, K*Wp*C)  bf16   row-im2col block (TM output rows)
    # w_ref: (K*Wp*C, W*O) bf16   banded conv weights (2-D tile, grid-invariant)
    # b_ref: (1, W*O)      f32    bias, tiled over W (lane-dense, grid-invariant)
    # o_ref: (TM, W*O)     bf16   lane-dense output block
    acc = jnp.dot(x_ref[...], w_ref[...], preferred_element_type=jnp.float32)
    o_ref[...] = (acc + b_ref[...]).astype(o_ref.dtype)


# Max row-block: multiple of 16 (bf16 sublane packing); 256..1024-sized tiles
# reach 63-86% of HBM roofline, and per-step VMEM stays tiny (~TM*1.9KB).
_TM_MAX = 512


def conv2d_same(x_nchw, weight_oihw, bias, kernel_size, *,
                channels_last=False, out_dtype=jnp.bfloat16):
    """Reflection-pad 'same' conv, PyTorch Conv2dSame semantics.

    x_nchw:      (N, C, H, W)
    weight_oihw: (O, C, K, K)   (PyTorch Conv2d weight layout)
    bias:        (O,)
    returns:     (N, O, H, W)  (or (N, H, W, O) if channels_last=True)
    """
    N, C, H, W = x_nchw.shape
    O = weight_oihw.shape[0]
    K = kernel_size
    ka = K // 2
    kb = ka - 1 if K % 2 == 0 else ka
    Hp, Wp = H + ka + kb, W + ka + kb
    KWC = K * Wp * C          # GEMM contraction dim (216 here)
    WO = W * O                # lane-dense output width (128 here)
    M = N * H                 # output rows handled by the GEMM

    # ---- glue (fused by XLA into the bf16 LHS materialization) ------------
    # NCHW -> NHWC, reflect pad, then row-im2col: for each output row (n, h)
    # concatenate the K padded input rows h .. h+K-1, each flattened to Wp*C.
    x_nhwc = jnp.transpose(x_nchw, (0, 2, 3, 1))                       # (N,H,W,C)
    xp = jnp.pad(x_nhwc, ((0, 0), (ka, kb), (ka, kb), (0, 0)), mode="reflect")
    rows = jnp.stack([xp[:, kh:kh + H] for kh in range(K)], axis=2)    # (N,H,K,Wp,C)
    lhs = rows.reshape(M, KWC).astype(jnp.bfloat16)                    # (M, KWC)

    # Banded weight: rhs[kh*Wp*C + p*C + c, w*O + o] = weight[o,c,kh,kw] iff p == w+kw.
    w_hwio = jnp.transpose(weight_oihw, (2, 3, 1, 0)).astype(jnp.float32)  # (K,K,C,O)
    onehot = (jnp.arange(Wp)[None, :, None]
              == (jnp.arange(W)[None, None, :] + jnp.arange(K)[:, None, None])
              ).astype(jnp.float32)                                    # (K(kw), Wp, W)
    wb5 = jnp.einsum("qpw,kqco->kpcwo", onehot, w_hwio)                # (K,Wp,C,W,O)
    rhs = wb5.reshape(KWC, WO).astype(jnp.bfloat16)

    # Bias tiled over W so it adds lane-dense in the epilogue.
    bias_row = jnp.tile(bias.astype(jnp.float32), W).reshape(1, WO)

    # ---- Pallas GEMM: row blocks of the (M, WO) output ---------------------
    # One fat step when M is small (here M=32 -> TM=32, grid=(1,)): no per-step
    # overhead to amortize.  For big M: largest multiple-of-16 block <= _TM_MAX
    # so bf16 sublanes pack fully and v7x gets >= 2 real blocks to shard.
    TM = min(-(-M // 16) * 16, _TM_MAX)
    M_pad = -(-M // TM) * TM
    if M_pad != M:
        lhs = jnp.pad(lhs, ((0, M_pad - M), (0, 0)))
    grid = (M_pad // TM,)

    out2d = pl.pallas_call(
        _gemm_bias_kernel,
        out_shape=jax.ShapeDtypeStruct((M_pad, WO), out_dtype),
        grid_spec=pltpu.PrefetchScalarGridSpec(
            num_scalar_prefetch=0,
            grid=grid,
            in_specs=[
                pl.BlockSpec((TM, KWC), lambda i: (i, 0)),   # LHS row block
                pl.BlockSpec((KWC, WO), lambda i: (0, 0)),   # banded weights (resident)
                pl.BlockSpec((1, WO), lambda i: (0, 0)),     # bias row (resident)
            ],
            out_specs=pl.BlockSpec((TM, WO), lambda i: (i, 0)),
        ),
        compiler_params=pltpu.CompilerParams(
            # Megacore sharding of row blocks when grid >= 2 (no-op at grid=(1,)).
            dimension_semantics=("parallel",),
            # v5e note: vmem_limit_bytes only needed if TM is pushed to ~8K+;
            # here per-step VMEM is a few hundred KB, far below every default.
        ),
    )(lhs, rhs, bias_row)

    if M_pad != M:
        out2d = out2d[:M]
    # (N*H, W*O) is bit-identical (row-major) to (N, H, W, O): reshape is free.
    out_nhwo = out2d.reshape(N, H, W, O)
    if channels_last:
        # Skip the layout transpose entirely when the consumer accepts NHWC.
        return out_nhwo
    # Single (now bf16 => half-size) HBM pass to return the module's native NCHW.
    return jnp.transpose(out_nhwo, (0, 3, 1, 2))


if __name__ == "__main__":
    # Module config (deterministic, synthetic): Conv2dSame(4, 8, 3, bias=True)
    in_channels, out_channels, kernel_size = 4, 8, 3
    N, H, W = 2, 16, 16

    key = jax.random.PRNGKey(0)
    kx, kw, kb_ = jax.random.split(key, 3)
    x = jax.random.normal(kx, (N, in_channels, H, W), dtype=jnp.float32)
    # Deterministic init mimicking PyTorch's uniform fan-in scaling.
    fan_in = in_channels * kernel_size * kernel_size
    bound = 1.0 / (fan_in ** 0.5)
    weight = jax.random.uniform(
        kw, (out_channels, in_channels, kernel_size, kernel_size),
        minval=-bound, maxval=bound, dtype=jnp.float32)
    bias = jax.random.uniform(
        kb_, (out_channels,), minval=-bound, maxval=bound, dtype=jnp.float32)

    conv_jit = jax.jit(conv2d_same, static_argnums=3)
    out = conv_jit(x, weight, bias, kernel_size)
    out = jax.block_until_ready(out)

    # References: reflection pad + VALID cross-correlation.
    ka = kernel_size // 2
    kbp = ka - 1 if kernel_size % 2 == 0 else ka
    xp_ref = jnp.pad(x, ((0, 0), (0, 0), (ka, kbp), (ka, kbp)), mode="reflect")
    ref_f32 = lax.conv_general_dilated(
        xp_ref, weight, window_strides=(1, 1), padding="VALID",
        dimension_numbers=("NCHW", "OIHW", "NCHW"),
    ) + bias[None, :, None, None]
    # bf16-input / f32-accumulate reference (matches the kernel's numerics
    # before the final bf16 output round).
    ref_bf16 = lax.conv_general_dilated(
        xp_ref.astype(jnp.bfloat16), weight.astype(jnp.bfloat16),
        window_strides=(1, 1), padding="VALID",
        dimension_numbers=("NCHW", "OIHW", "NCHW"),
        preferred_element_type=jnp.float32,
    ) + bias[None, :, None, None]

    assert out.shape == (N, out_channels, H, W)
    assert out.dtype == jnp.bfloat16  # bf16 output per perf review (out_dtype knob for f32)
    out_f32 = out.astype(jnp.float32)
    # Tolerances include the final bf16 rounding of the f32 accumulator.
    assert jnp.allclose(out_f32, ref_bf16, atol=1e-2, rtol=1e-2)
    assert jnp.allclose(out_f32, ref_f32, atol=5e-2, rtol=5e-2)

    print("KERNEL_OK")
</pallas_src>

<mosaic_0001>
module attributes {stable_mosaic.version = 11 : i64} {
  func.func @_gemm_bias_kernel(%arg0: i32, %arg1: memref<32x216xbf16, #tpu.memory_space<vmem>>, %arg2: memref<216x128xbf16, #tpu.memory_space<vmem>>, %arg3: memref<1x128xf32, #tpu.memory_space<vmem>>, %arg4: memref<32x128xbf16, #tpu.memory_space<vmem>>) attributes {dimension_semantics = [#tpu.dimension_semantics<parallel>], iteration_bounds = array<i64: 1>, scalar_prefetch = 0 : i64, scratch_operands = 0 : i64, tpu.core_type = #tpu.core_type<tc>, window_params = [{transform_indices = @transform_0, window_bounds = array<i64: 32, 216>}, {pipeline_mode = #tpu.pipeline_mode<synchronous>, transform_indices = @transform_1, window_bounds = array<i64: 216, 128>}, {pipeline_mode = #tpu.pipeline_mode<synchronous>, transform_indices = @transform_2, window_bounds = array<i64: 1, 128>}, {transform_indices = @transform_3, window_bounds = array<i64: 32, 128>}]} {
    %c0 = arith.constant 0 : index
    %c0_0 = arith.constant 0 : index
    %0 = vector.load %arg1[%c0, %c0_0] : memref<32x216xbf16, #tpu.memory_space<vmem>>, vector<32x216xbf16>
    %c0_1 = arith.constant 0 : index
    %c0_2 = arith.constant 0 : index
    %1 = vector.load %arg2[%c0_1, %c0_2] : memref<216x128xbf16, #tpu.memory_space<vmem>>, vector<216x128xbf16>
    %cst = arith.constant dense<0.000000e+00> : vector<32x128xf32>
    %2 = tpu.matmul %0, %1, %cst {dimension_numbers = #tpu.dot_dimension_numbers<[1], [0], [0], [1], [0, 0, 1, 1], [], []>} : vector<32x216xbf16>, vector<216x128xbf16>, vector<32x128xf32> -> vector<32x128xf32>
    %c0_3 = arith.constant 0 : index
    %c0_4 = arith.constant 0 : index
    %3 = vector.load %arg3[%c0_3, %c0_4] : memref<1x128xf32, #tpu.memory_space<vmem>>, vector<1x128xf32>
    %4 = vector.broadcast %3 : vector<1x128xf32> to vector<32x128xf32>
    %5 = arith.addf %2, %4 : vector<32x128xf32>
    %6 = arith.truncf %5 : vector<32x128xf32> to vector<32x128xbf16>
    %c0_5 = arith.constant 0 : index
    %c0_6 = arith.constant 0 : index
    %7 = vector.load %arg4[%c0_5, %c0_6] : memref<32x128xbf16, #tpu.memory_space<vmem>>, vector<32x128xbf16>
    tpu.vector_store %arg4[%c0_5, %c0_6], %6 {strides = array<i32>} : memref<32x128xbf16, #tpu.memory_space<vmem>>, vector<32x128xbf16>,
    return
  }
  func.func @transform_0(%arg0: i32) -> (i32, i32) {
    %c0_i32 = arith.constant 0 : i32
    %c0_i32_0 = arith.constant 0 : i32
    return %arg0, %c0_i32 : i32, i32
  }
  func.func @transform_1(%arg0: i32) -> (i32, i32) {
    %c0_i32 = arith.constant 0 : i32
    %c0_i32_0 = arith.constant 0 : i32
    %c0_i32_1 = arith.constant 0 : i32
    return %c0_i32, %c0_i32_0 : i32, i32
  }
  func.func @transform_2(%arg0: i32) -> (i32, i32) {
    %c0_i32 = arith.constant 0 : i32
    %c0_i32_0 = arith.constant 0 : i32
    %c0_i32_1 = arith.constant 0 : i32
    return %c0_i32, %c0_i32_0 : i32, i32
  }
  func.func @transform_3(%arg0: i32) -> (i32, i32) {
    %c0_i32 = arith.constant 0 : i32
    %c0_i32_0 = arith.constant 0 : i32
    return %arg0, %c0_i32 : i32, i32
  }
}

</mosaic_0001>

<bundles_post_ra>
// kernel: tile.8
= control target key start
LH: loop header
LB: loop body
LE: loop exit
PB: predicated region body
PF: predicated region fallthrough
CT: control target
= control target key end

     0   :  { %s28_s0 = inlined_call_operand.vmem [shape: f32[8], index: 0, kind: input, shape index: {}]   ;;  %s29_s1 = inlined_call_operand.vmem [shape: f32[16,8], index: 1, kind: output, shape index: {}]  }
   0x1   :  { %v4_v0 = vld [vmem:[%s28_s0] ss:$0 sm:$0xff] }
   0x2   :  { %5 = vst [vmem:[%s29_s1] sm:$0xff] %v4_v0  ;;  %8 = vst [vmem:[%s29_s1 + $0x8] sm:$0xff] %v4_v0 }

// kernel: tile.9
= control target key start
LH: loop header
LB: loop body
LE: loop exit
PB: predicated region body
PF: predicated region fallthrough
CT: control target
= control target key end

     0   :  { %s131_s10 = smov 120   ;;  %s132_s11 = smov 104   ;;  %vm3_vm0 = vcmask 64512   ;;  %vm9_vm1 = vcmask 1048512   ;;  %vm15_vm2 = vcmask 982912   ;;  %vm21_vm3 = vcmask 917312   ;;  %s207_s0 = inlined_call_operand.vmem [shape: f32[16,8], index: 0, kind: input, shape index: {}]   ;;  %s208_s1 = inlined_call_operand.vmem [shape: f32[1,128], index: 1, kind: output, shape index: {}]  }
   0x1   :  { %v101_v0 = vld [vmem:[%s207_s0 + $0xf] sm:$0x1]   ;;  %v103_v1 = vld [vmem:[%s207_s0 + $0xd] sm:$0x1]   ;;  %v102_v2 = vld [vmem:[%s207_s0 + $0xe] sm:$0x1]  }
   0x2   :  { %7 = vrot.lane.b32.xlu0 %v101_v0, %s131_s10  ;;  %19 = vrot.lane.b32.xlu1 %v103_v1, %s132_s11  ;;  %v104_v3 = vld [vmem:[%s207_s0 + $0xc] sm:$0x1]   ;;  %s133_s16 = smov 112   ;;  %s134_s17 = smov 96   ;;  %v105_v4 = vld [vmem:[%s207_s0 + $0xb] sm:$0x1]  }
   0x3   :  { %v106_v5 = vld [vmem:[%s207_s0 + $0xa] sm:$0x1]   ;;  %v2_v6 = vld [vmem:[%s207_s0] sm:$0x1]   ;;  %s135_s24 = smov 88   ;;  %s136_s25 = smov 80  }
   0x4   :  { %4 = vst.msk [vmem:[#allocation0] sm:$0x1] %vm3_vm0, %v2_v6   ;;  %v107_v7 = vld [vmem:[%s207_s0 + $0x9] sm:$0x1]   ;;  %v108_v8 = vld [vmem:[%s207_s0 + $0x8] sm:$0x1]  }
   0x5   :  { %s137_s30 = smov 72   ;;  %s138_s2 = smov 64   ;;  %v109_v9 = vld [vmem:[%s207_s0 + $0x7] sm:$0x1]   ;;  %v110_v10 = vld [vmem:[%s207_s0 + $0x6] sm:$0x1]  }
   0x6   :  { %13 = vrot.lane.b32.xlu0 %v102_v2, %s133_s16  ;;  %25 = vrot.lane.b32.xlu1 %v104_v3, %s134_s17  ;;  %s139_s7 = smov 56   ;;  %s140_s8 = smov 48   ;;  %v111_v11 = vld [vmem:[%s207_s0 + $0x5] sm:$0x1]   ;;  %v112_v12 = vld [vmem:[%s207_s0 + $0x4] sm:$0x1]  }
   0x7   :  { %s141_s13 = smov 40   ;;  %s142_s14 = smov 32   ;;  %v113_v13 = vld [vmem:[%s207_s0 + $0x3] sm:$0x1]   ;;  %v114_v14 = vld [vmem:[%s207_s0 + $0x2] sm:$0x1]  }
   0x8   :  { %s143_s19 = smov 24   ;;  %s144_s20 = smov 16   ;;  %v115_v15 = vld [vmem:[%s207_s0 + $0x1] sm:$0x1]   ;;  %vm27_vm4 = vcmask 851712   ;;  %vm33_vm5 = vcmask 786112  }
   0x9   :  { %s145_s0 = smov 8   ;;  %vm39_vm6 = vcmask 720512   ;;  %vm45_vm7 = vcmask 654912   ;;  %vm51_vm8 = vcmask 589312   ;;  %vm57_vm9 = vcmask 523712  }
   0xa   :  { %31 = vrot.lane.b32.xlu0 %v105_v4, %s135_s24  ;;  %37 = vrot.lane.b32.xlu1 %v106_v5, %s136_s25  ;;  %vm63_vm10 = vcmask 458112   ;;  %vm69_vm11 = vcmask 392512   ;;  %vm75_vm12 = vcmask 326912   ;;  %vm81_vm13 = vcmask 261312  }
   0xb   :  { %vm87_vm14 = vcmask 195712   ;;  %vm93_vm15 = vcmask 130112  }
   0xe   :  { %43 = vrot.lane.b32.xlu0 %v107_v7, %s137_s30  ;;  %49 = vrot.lane.b32.xlu1 %v108_v8, %s138_s2 }
  0x12   :  { %55 = vrot.lane.b32.xlu0 %v109_v9, %s139_s7  ;;  %61 = vrot.lane.b32.xlu1 %v110_v10, %s140_s8 }
  0x16   :  { %67 = vrot.lane.b32.xlu0 %v111_v11, %s141_s13  ;;  %73 = vrot.lane.b32.xlu1 %v112_v12, %s142_s14 }
  0x1a   :  { %79 = vrot.lane.b32.xlu0 %v113_v13, %s143_s19  ;;  %85 = vrot.lane.b32.xlu1 %v114_v14, %s144_s20 }
  0x1e   :  { %91 = vrot.lane.b32.xlu0 %v115_v15, %s145_s0 }
  0x74   :  { %v8_v16 = vpop.permute.xlu0 %7   ;;  %v20_v17 = vpop.permute.xlu1 %19  }
  0x75   :  { %10 = vst.msk [vmem:[#allocation0] sm:$0x1] %vm9_vm1, %v8_v16  }
  0x78   :  { %v14_v18 = vpop.permute.xlu0 %13   ;;  %v26_v19 = vpop.permute.xlu1 %25  }
  0x79   :  { %16 = vst.msk [vmem:[#allocation0] sm:$0x1] %vm15_vm2, %v14_v18  }
  0x7a   :  { %22 = vst.msk [vmem:[#allocation0] sm:$0x1] %vm21_vm3, %v20_v17  }
  0x7b   :  { %28 = vst.msk [vmem:[#allocation0] sm:$0x1] %vm27_vm4, %v26_v19  }
  0x7c   :  { %v32_v20 = vpop.permute.xlu0 %31   ;;  %v38_v21 = vpop.permute.xlu1 %37  }
  0x7d   :  { %34 = vst.msk [vmem:[#allocation0] sm:$0x1] %vm33_vm5, %v32_v20  }
  0x7e   :  { %40 = vst.msk [vmem:[#allocation0] sm:$0x1] %vm39_vm6, %v38_v21  }
  0x80   :  { %v44_v22 = vpop.permute.xlu0 %43   ;;  %v50_v23 = vpop.permute.xlu1 %49  }
  0x81   :  { %46 = vst.msk [vmem:[#allocation0] sm:$0x1] %vm45_vm7, %v44_v22  }
  0x82   :  { %52 = vst.msk [vmem:[#allocation0] sm:$0x1] %vm51_vm8, %v50_v23  }
  0x84   :  { %v56_v24 = vpop.permute.xlu0 %55   ;;  %v62_v25 = vpop.permute.xlu1 %61  }
  0x85   :  { %58 = vst.msk [vmem:[#allocation0] sm:$0x1] %vm57_vm9, %v56_v24  }
  0x86   :  { %64 = vst.msk [vmem:[#allocation0] sm:$0x1] %vm63_vm10, %v62_v25  }
  0x88   :  { %v68_v26 = vpop.permute.xlu0 %67   ;;  %v74_v27 = vpop.permute.xlu1 %73  }
  0x89   :  { %70 = vst.msk [vmem:[#allocation0] sm:$0x1] %vm69_vm11, %v68_v26  }
  0x8a   :  { %76 = vst.msk [vmem:[#allocation0] sm:$0x1] %vm75_vm12, %v74_v27  }
  0x8c   :  { %v80_v28 = vpop.permute.xlu0 %79   ;;  %v86_v29 = vpop.permute.xlu1 %85  }
  0x8d   :  { %82 = vst.msk [vmem:[#allocation0] sm:$0x1] %vm81_vm13, %v80_v28  }
  0x8e   :  { %88 = vst.msk [vmem:[#allocation0] sm:$0x1] %vm87_vm14, %v86_v29  }
  0x90   :  { %v92_v30 = vpop.permute.xlu0 %91  }
  0x91   :  { %94 = vst.msk [vmem:[#allocation0] sm:$0x1] %vm93_vm15, %v92_v30  }
  0x98   :  { %v98_v31 = vld [vmem:[#allocation0] sm:$0x1] }
  0x99   :  { %100 = vst [vmem:[%s208_s1] sm:$0x1] %v98_v31 }

// kernel: conv2d_same.1
= control target key start
LH: loop header
LB: loop body
LE: loop exit
PB: predicated region body
PF: predicated region fallthrough
CT: control target
= control target key end

     0   :  { %v325_v0 = vmov 0   ;;  %vm152_vm0 = vcmask 719872   ;;  %vm159_vm1 = vcmask 1043456   ;;  %s437_s1 = inlined_call_operand.vmem [shape: bf16[216,128], index: 1, kind: input, shape index: {}]   ;;  %s438_s0 = inlined_call_operand.vmem [shape: bf16[32,216], index: 0, kind: input, shape index: {}]   ;;  %s439_s2 = inlined_call_operand.vmem [shape: f32[1,128], index: 2, kind: input, shape index: {}]   ;;  %s440_s3 = inlined_call_operand.vmem [shape: bf16[32,128], index: 3, kind: output, shape index: {}]  }
   0x1   :  { %163 = vmatprep.subr.bf16.mxu0 %v325_v0  ;;  %276 = vmatprep.subr.bf16.mxu1 %v325_v0  ;;  %v305_v1 = vld [vmem:[%s437_s1] sm:$0xff]   ;;  %v306_v2 = vld [vmem:[%s437_s1 + $0x8] sm:$0xff]   ;;  %v307_v3 = vld [vmem:[%s437_s1 + $0x10] sm:$0xff]  }
   0x2   :  { %164 = vmatpush1.bf16.msra.mxu0 %v305_v1  ;;  %290 = vmatpush1.bf16.msra.mxu1 %v305_v1  ;;  %v308_v4 = vld [vmem:[%s437_s1 + $0x18] sm:$0xff]   ;;  %v309_v5 = vld [vmem:[%s437_s1 + $0x20] sm:$0xff]   ;;  %v310_v8 = vld [vmem:[%s437_s1 + $0x28] sm:$0xff]  }
   0x3   :  { %165 = vmatprep.subr.bf16.mxu0 %v325_v0  ;;  %277 = vmatprep.subr.bf16.mxu1 %v325_v0  ;;  %v321_v6 = vld [vmem:[%s438_s0 + $0x4] ss:$8 sps:$4 sm:$0xff]   ;;  %v324_v7 = vld [vmem:[%s438_s0 + $0x14] ss:$8 sps:$4 sm:$0xff]   ;;  %v318_v16 = vld [vmem:[%s437_s1 + $0x68] ss:$0 sps:$4 sm:$0xff]  }
   0x4   :  { %255 = vmatprep.mubr.msk.bf16.mxu0 %vm152_vm0, %v321_v6  ;;  %256 = vmatprep.mubr.msk.bf16.mxu1 %vm152_vm0, %v324_v7  ;;  %v311_v9 = vld [vmem:[%s437_s1 + $0x30] sm:$0xff]   ;;  %v312_v10 = vld [vmem:[%s437_s1 + $0x38] sm:$0xff]   ;;  %v313_v11 = vld [vmem:[%s437_s1 + $0x40] sm:$0xff]   ;;  %v161_v17 = vsel %vm159_vm1, %v318_v16, 0 }
   0x5   :  { %v314_v12 = vld [vmem:[%s437_s1 + $0x48] sm:$0xff]   ;;  %v315_v13 = vld [vmem:[%s437_s1 + $0x50] sm:$0xff]   ;;  %v316_v14 = vld [vmem:[%s437_s1 + $0x58] sm:$0xff]  }
   0x6   :  { %166 = vmatpush1.bf16.msra.mxu0 %v306_v2  ;;  %291 = vmatpush1.bf16.msra.mxu1 %v306_v2  ;;  %v317_v15 = vld [vmem:[%s437_s1 + $0x60] sm:$0xff]   ;;  %v322_v19 = vld [vmem:[%s438_s0 + $0x10] ss:$8 sps:$4 sm:$0xff]  }
   0x7   :  { %167 = vmatprep.subr.bf16.mxu0 %v325_v0  ;;  %278 = vmatprep.subr.bf16.mxu1 %v325_v0  ;;  %v319_v18 = vld [vmem:[%s438_s0] ss:$8 sps:$4 sm:$0xff]  }
   0x8   :  { %v236_v20 = vld [vmem:[%s439_s2] ss:$0 sm:$0xff] }
   0xa   :  { %168 = vmatpush1.bf16.msra.mxu0 %v307_v3  ;;  %292 = vmatpush1.bf16.msra.mxu1 %v307_v3 }
   0xb   :  { %169 = vmatprep.subr.bf16.mxu0 %v325_v0  ;;  %279 = vmatprep.subr.bf16.mxu1 %v325_v0 }
   0xe   :  { %170 = vmatpush1.bf16.msra.mxu0 %v308_v4  ;;  %293 = vmatpush1.bf16.msra.mxu1 %v308_v4 }
   0xf   :  { %171 = vmatprep.subr.bf16.mxu0 %v325_v0  ;;  %280 = vmatprep.subr.bf16.mxu1 %v325_v0 }
  0x12   :  { %172 = vmatpush1.bf16.msra.mxu0 %v309_v5  ;;  %294 = vmatpush1.bf16.msra.mxu1 %v309_v5 }
  0x13   :  { %173 = vmatprep.subr.bf16.mxu0 %v325_v0  ;;  %281 = vmatprep.subr.bf16.mxu1 %v325_v0 }
  0x16   :  { %174 = vmatpush1.bf16.msra.mxu0 %v310_v8  ;;  %295 = vmatpush1.bf16.msra.mxu1 %v310_v8 }
  0x17   :  { %175 = vmatprep.subr.bf16.mxu0 %v325_v0  ;;  %282 = vmatprep.subr.bf16.mxu1 %v325_v0 }
  0x1a   :  { %176 = vmatpush1.bf16.msra.mxu0 %v311_v9  ;;  %296 = vmatpush1.bf16.msra.mxu1 %v311_v9 }
  0x1b   :  { %177 = vmatprep.subr.bf16.mxu0 %v325_v0  ;;  %283 = vmatprep.subr.bf16.mxu1 %v325_v0 }
  0x1e   :  { %178 = vmatpush1.bf16.msra.mxu0 %v312_v10  ;;  %297 = vmatpush1.bf16.msra.mxu1 %v312_v10 }
  0x1f   :  { %179 = vmatprep.subr.bf16.mxu0 %v325_v0  ;;  %284 = vmatprep.subr.bf16.mxu1 %v325_v0 }
  0x22   :  { %180 = vmatpush1.bf16.msra.mxu0 %v313_v11  ;;  %298 = vmatpush1.bf16.msra.mxu1 %v313_v11 }
  0x23   :  { %181 = vmatprep.subr.bf16.mxu0 %v325_v0  ;;  %285 = vmatprep.subr.bf16.mxu1 %v325_v0 }
  0x26   :  { %182 = vmatpush1.bf16.msra.mxu0 %v314_v12  ;;  %299 = vmatpush1.bf16.msra.mxu1 %v314_v12 }
  0x27   :  { %183 = vmatprep.subr.bf16.mxu0 %v325_v0  ;;  %286 = vmatprep.subr.bf16.mxu1 %v325_v0 }
  0x2a   :  { %184 = vmatpush1.bf16.msra.mxu0 %v315_v13  ;;  %300 = vmatpush1.bf16.msra.mxu1 %v315_v13 }
  0x2b   :  { %185 = vmatprep.subr.bf16.mxu0 %v325_v0  ;;  %287 = vmatprep.subr.bf16.mxu1 %v325_v0 }
  0x2e   :  { %186 = vmatpush1.bf16.msra.mxu0 %v316_v14  ;;  %301 = vmatpush1.bf16.msra.mxu1 %v316_v14 }
  0x2f   :  { %187 = vmatprep.subr.bf16.mxu0 %v325_v0  ;;  %288 = vmatprep.subr.bf16.mxu1 %v325_v0 }
  0x32   :  { %188 = vmatpush1.bf16.msra.mxu0 %v317_v15  ;;  %302 = vmatpush1.bf16.msra.mxu1 %v317_v15 }
  0x33   :  { %189 = vmatprep.subr.bf16.mxu0 %v325_v0  ;;  %289 = vmatprep.subr.bf16.mxu1 %v325_v0 }
  0x36   :  { %190 = vmatpush1.bf16.msra.mxu0 %v161_v17  ;;  %303 = vmatpush1.bf16.msra.mxu1 %v161_v17 }
  0x39   :  { %196 = vmatmul.mubr.bf16.vlgmr.msra.gmra.mrb[0].mxu0 %v319_v18  ;;  %204 = vmatmul.mubr.bf16.vlgmr.msra.gmra.mrb[0].mxu1 %v322_v19 }
 0x10c   :  { %v197_v21 = vpop.f32.mrb[0].mxu0  ;;  %v205_v22 = vpop.f32.mrb[0].mxu1 }
 0x10d   :  { %v199_v23 = vpop.f32.mrb[1].mxu0  ;;  %v207_v24 = vpop.f32.mrb[1].mxu1  ;;  %v198_v27 = vadd.f32 %v236_v20, %v197_v21  ;;  %v206_v28 = vadd.f32 %v236_v20, %v205_v22 }
 0x10e   :  { %v200_v25 = vpop.f32.mrb[2].mxu0  ;;  %v208_v26 = vpop.f32.mrb[2].mxu1 }
 0x10f   :  { %v201_v29 = vadd.f32 %v236_v20, %v200_v25  ;;  %v209_v30 = vadd.f32 %v236_v20, %v208_v26  ;;  %v202_v31 = vpop.f32.mrb[3].mxu0  ;;  %v210_v32 = vpop.f32.mrb[3].mxu1 }
 0x111   :  { %v268_v33 = vpack.c.bf16 %v201_v29, %v198_v27  ;;  %v273_v34 = vpack.c.bf16 %v209_v30, %v206_v28 }
 0x113   :  { %269 = vst [vmem:[%s440_s3] sm:$0xff] %v268_v33   ;;  %275 = vst [vmem:[%s440_s3 + $0x8] sm:$0xff] %v273_v34  }

</bundles_post_ra>
